<compile_context>
chip_gen: v7x
topology: tpu7x:2x2x1
jax: 0.10.0
libtpu: 0.0.40
codegen_flags: <defaults>
</compile_context>

<pallas_src>
import jax
import jax.numpy as jnp
from jax import lax
from jax.experimental import pallas as pl
from jax.experimental.pallas import tpu as pltpu


def _svm_kernel(seq_ref, w_ref, b_ref, out_ref):
    # seq_ref: (TB, S) input dtype (streamed per grid step)
    # w_ref:   (2, S)  f32, lane-dense, resident across grid steps
    # b_ref:   (1, 2)  f32, resident across grid steps
    # out_ref: (TB, 2) f32
    x = seq_ref[...].astype(jnp.float32)          # `.float()` done on-chip (VPU, hidden under DMA)
    w = w_ref[...]
    acc = lax.dot_general(                        # (TB, S) x (2, S) -> (TB, 2) on the MXU
        x, w,
        dimension_numbers=(((1,), (1,)), ((), ())),
        preferred_element_type=jnp.float32,
    )
    out_ref[...] = acc + b_ref[...]               # bias broadcast over the batch tile


def svm_forward(seq, weight, bias, Gdata=None, *, max_tile_bytes=4 * 1024 * 1024):
    """Pallas equivalent of SVM.forward(seq, Gdata).

    seq:    (B, S) any float/int dtype (cast to f32 inside the kernel)
    weight: (2, S) PyTorch nn.Linear weight layout (kept lane-dense, no transpose)
    bias:   (2,)
    Gdata:  ignored (unused by the reference forward)
    """
    B, S = seq.shape
    w = weight.astype(jnp.float32)                        # (2, S)
    b2d = bias.astype(jnp.float32).reshape(1, 2)          # (1, 2)

    itemsize = jnp.dtype(seq.dtype).itemsize
    # Rows per tile: largest multiple of 8 with TB * S * itemsize <= max_tile_bytes.
    tb = max(8, (max_tile_bytes // max(1, S * itemsize)) // 8 * 8)
    tb = min(tb, max(8, -(-B // 8) * 8))                  # don't exceed (padded) batch

    # Pad the batch so the grid divides evenly; trim the result afterwards.
    b_pad = -(-B // tb) * tb
    if b_pad != B:
        seq = jnp.pad(seq, ((0, b_pad - B), (0, 0)))

    grid = (b_pad // tb,)

    out = pl.pallas_call(
        _svm_kernel,
        out_shape=jax.ShapeDtypeStruct((b_pad, 2), jnp.float32),
        grid_spec=pltpu.PrefetchScalarGridSpec(
            num_scalar_prefetch=0,
            grid=grid,
            in_specs=[
                pl.BlockSpec((tb, S), lambda i: (i, 0)),   # streamed + double-buffered
                pl.BlockSpec((2, S), lambda i: (0, 0)),    # resident weight
                pl.BlockSpec((1, 2), lambda i: (0, 0)),    # resident bias
            ],
            out_specs=pl.BlockSpec((tb, 2), lambda i: (i, 0)),
        ),
        compiler_params=pltpu.CompilerParams(
            dimension_semantics=("parallel",),             # v7x: shard batch over 2 TCs
        ),
        cost_estimate=pl.CostEstimate(
            flops=2 * b_pad * S * 2,
            transcendentals=0,
            bytes_accessed=b_pad * S * itemsize + 2 * S * 4 + b_pad * 2 * 4,
        ),
    )(seq, w, b2d)

    return out[:B]


if __name__ == "__main__":
    # args.seq_length -> S ; small synthetic shapes
    B, S = 8, 32

    key = jax.random.PRNGKey(0)
    k_seq, k_w, k_b = jax.random.split(key, 3)

    # Deterministic parameter init (mimics nn.Linear uniform(-1/sqrt(S), 1/sqrt(S)))
    bound = 1.0 / jnp.sqrt(jnp.float32(S))
    weight = jax.random.uniform(k_w, (2, S), jnp.float32, -bound, bound)
    bias = jax.random.uniform(k_b, (2,), jnp.float32, -bound, bound)

    seq = jax.random.normal(k_seq, (B, S), jnp.float32)
    Gdata = None  # unused by forward

    out = svm_forward(seq, weight, bias, Gdata)
    out = jax.block_until_ready(out)

    # Reference check against plain JAX
    ref = seq.astype(jnp.float32) @ weight.T + bias
    assert out.shape == (B, 2)
    assert jnp.allclose(out, ref, atol=1e-5, rtol=1e-5)

    print("KERNEL_OK")
</pallas_src>

<mosaic_0001>
module attributes {stable_mosaic.version = 11 : i64} {
  func.func @_svm_kernel(%arg0: i32, %arg1: memref<8x32xf32, #tpu.memory_space<vmem>>, %arg2: memref<2x32xf32, #tpu.memory_space<vmem>>, %arg3: memref<1x2xf32, #tpu.memory_space<vmem>>, %arg4: memref<8x2xf32, #tpu.memory_space<vmem>>) attributes {dimension_semantics = [#tpu.dimension_semantics<parallel>], iteration_bounds = array<i64: 1>, scalar_prefetch = 0 : i64, scratch_operands = 0 : i64, tpu.core_type = #tpu.core_type<tc>, window_params = [{transform_indices = @transform_0, window_bounds = array<i64: 8, 32>}, {pipeline_mode = #tpu.pipeline_mode<synchronous>, transform_indices = @transform_1, window_bounds = array<i64: 2, 32>}, {pipeline_mode = #tpu.pipeline_mode<synchronous>, transform_indices = @transform_2, window_bounds = array<i64: 1, 2>}, {transform_indices = @transform_3, window_bounds = array<i64: 8, 2>}]} {
    %c0 = arith.constant 0 : index
    %c0_0 = arith.constant 0 : index
    %0 = vector.load %arg1[%c0, %c0_0] : memref<8x32xf32, #tpu.memory_space<vmem>>, vector<8x32xf32>
    %c0_1 = arith.constant 0 : index
    %c0_2 = arith.constant 0 : index
    %1 = vector.load %arg2[%c0_1, %c0_2] : memref<2x32xf32, #tpu.memory_space<vmem>>, vector<2x32xf32>
    %cst = arith.constant dense<0.000000e+00> : vector<8x2xf32>
    %2 = tpu.matmul %0, %1, %cst {dimension_numbers = #tpu.dot_dimension_numbers<[1], [1], [0], [0], [0, 0, 1, 0], [], []>} : vector<8x32xf32>, vector<2x32xf32>, vector<8x2xf32> -> vector<8x2xf32>
    %c0_3 = arith.constant 0 : index
    %c0_4 = arith.constant 0 : index
    %3 = vector.load %arg3[%c0_3, %c0_4] : memref<1x2xf32, #tpu.memory_space<vmem>>, vector<1x2xf32>
    %4 = vector.broadcast %3 : vector<1x2xf32> to vector<8x2xf32>
    %5 = arith.addf %2, %4 : vector<8x2xf32>
    %c0_5 = arith.constant 0 : index
    %c0_6 = arith.constant 0 : index
    %6 = vector.load %arg4[%c0_5, %c0_6] : memref<8x2xf32, #tpu.memory_space<vmem>>, vector<8x2xf32>
    tpu.vector_store %arg4[%c0_5, %c0_6], %5 {strides = array<i32>} : memref<8x2xf32, #tpu.memory_space<vmem>>, vector<8x2xf32>,
    return
  }
  func.func @transform_0(%arg0: i32) -> (i32, i32) {
    %c0_i32 = arith.constant 0 : i32
    %c0_i32_0 = arith.constant 0 : i32
    return %arg0, %c0_i32 : i32, i32
  }
  func.func @transform_1(%arg0: i32) -> (i32, i32) {
    %c0_i32 = arith.constant 0 : i32
    %c0_i32_0 = arith.constant 0 : i32
    %c0_i32_1 = arith.constant 0 : i32
    return %c0_i32, %c0_i32_0 : i32, i32
  }
  func.func @transform_2(%arg0: i32) -> (i32, i32) {
    %c0_i32 = arith.constant 0 : i32
    %c0_i32_0 = arith.constant 0 : i32
    %c0_i32_1 = arith.constant 0 : i32
    return %c0_i32, %c0_i32_0 : i32, i32
  }
  func.func @transform_3(%arg0: i32) -> (i32, i32) {
    %c0_i32 = arith.constant 0 : i32
    %c0_i32_0 = arith.constant 0 : i32
    return %arg0, %c0_i32 : i32, i32
  }
}

</mosaic_0001>

<bundles_post_ra>
// kernel: tpu_custom_call.1
= control target key start
LH: loop header
LB: loop body
LE: loop exit
PB: predicated region body
PF: predicated region fallthrough
CT: control target
= control target key end

     0   :  { %8 = vsyncpa [#allocation3], 0  ;;  %s156_s12 = smov [#allocation2]   ;;  %s200_s0 = inlined_call_operand.hbm [shape: f32[8,32], index: 0, kind: input, shape index: {}]   ;;  %s201_s1 = inlined_call_operand.vmem [shape: f32[2,32], index: 1, kind: input, shape index: {}]   ;;  %s202_s2 = inlined_call_operand.vmem [shape: f32[1,2], index: 2, kind: input, shape index: {}]   ;;  %s203_s3 = inlined_call_operand.vmem [shape: f32[8,2], index: 3, kind: output, shape index: {}]  }
   0x1   :  { %s15_s13 = sshll.u32 %s156_s12, 4  ;;  %s132_s16 = scalar_lea.hbm %s200_s0, 128  ;;  %s16_s13 = int_to_ptr.vmem [resolvable:$true] %s15_s13 }
   0x2   :  { %p133_p0 = scmp.ne.s32.totalorder %s200_s0, %s132_s16  ;;  %p136_p1 = scmp.lt.u32.totalorder %s132_s16, %s200_s0 }
   0x4   :  { %p138_p2 = pnand %p136_p1, %p133_p0 }
   0x6   :  { %141 = shalt.err (!%p138_p2)
}
   0x7   :  { %s142_s21 = scalar_lea.vmem %s16_s13, 128  ;;  %p147_p4 = scmp.lt.s32.totalorder %s16_s13, %s16_s13 }
   0x8   :  { %p143_p3 = scmp.ne.s32.totalorder %s16_s13, %s142_s21  ;;  %p148_p5 = scmp.lt.s32.totalorder %s142_s21, %s142_s21 }
   0xa   :  { %p149_p6 = por %p148_p5, %p147_p4 }
   0xc   :  { %p150_p7 = pnand %p149_p6, %p143_p3 }
   0xe   :  { %153 = shalt.err (!%p150_p7)
}
   0xf   :  { %18 = dma.hbm_to_vmem [thread:$0]  %s200_s0, 128, %s16_s13, [#allocation3]  }
  0x10   :  { %154 = dma.done.wait [#allocation3], 128  }
  0x11   :  { %155 = vsyncadd [#allocation3], 4294967168  ;;  %v157_v0 = vmov 0.0   ;;  %vm158_vm0 = vmmov 0   ;;  %vm35_vm1 = vcmask 261120   ;;  %v26_v2 = vld [vmem:[#allocation2] sm:$0xff] }
  0x12   :  { %124 = vmatprep.subr.mxu0 %v157_v0  ;;  %126 = vmatprep.mubr.msk.f32.mxu0 %vm158_vm0, %v157_v0  ;;  %v27_v1 = vld [vmem:[%s201_s1] sm:$0x3]  ;;  %vm112_vm2 = vcmask 15360  }
  0x13   :  { %125 = vmatpush3.xpose.msk.msra.mxu0 %vm35_vm1, %v27_v1  ;;  %v119_v3 = vld [vmem:[%s202_s2] ss:$0 sm:$0xff] }
  0x16   :  { %127 = vmatmul.mubr.msk.f32.vlgmr.msra.gmra.mrb[0].mxu0 %vm35_vm1, %v26_v2 }
  0xe9   :  { %v108_v4 = vpop.f32.mrb[0].mxu0 }
  0xea   :  { %v109_v5 = vadd.f32 %v119_v3, %v108_v4  ;;  %v128_v6 = vpop.f32.mrb[1].mxu0 }
  0xec   :  { %113 = vst.msk [vmem:[%s203_s3] sm:$0xff] %vm112_vm2, %v109_v5 }
  0xed   :  { %118 = vsyncpa [#allocation3], 1 }

</bundles_post_ra>
